<compile_context>
chip_gen: v7x
topology: tpu7x:2x2x1
jax: 0.10.0
libtpu: 0.0.40
codegen_flags: <defaults>
</compile_context>

<pallas_src>
import jax
import jax.numpy as jnp
from jax import lax
from jax.experimental import pallas as pl
from jax.experimental.pallas import tpu as pltpu


def _log_sigmoid(x):
    # Numerically stable: logsigmoid(x) = min(x, 0) - log(1 + exp(-|x|)).
    # (log1p would be marginally more accurate for large |x| but log(1 + .)
    #  keeps the Mosaic lowering simple and is well within 1e-5 tolerance.)
    return jnp.minimum(x, 0.0) - jnp.log(1.0 + jnp.exp(-jnp.abs(x)))


def skipgram_kernel(pos_u_ref, pos_v_ref, neg_v_ref, u_ref, v_ref, out_ref):
    # pos_u_ref: (B, 1)   int32   center-word indices
    # pos_v_ref: (B, 1)   int32   context-word indices
    # neg_v_ref: (B*K, 1) int32   negative-sample indices (row r = i*K + k)
    # u_ref:     (V, D)   f32     u_embeddings table (whole table in VMEM)
    # v_ref:     (V, D)   f32     v_embeddings table (whole table in VMEM)
    # out_ref:   (8, 128) f32     lane-dense tile; total sum broadcast into it
    V = u_ref.shape[0]
    B = pos_u_ref.shape[0]
    BK = neg_v_ref.shape[0]
    K = BK // B

    u_w = u_ref[...]  # (V, D)
    v_w = v_ref[...]  # (V, D)

    # --- Row gathers as one-hot @ table matmuls (MXU), all 2-D, no masked
    #     sublane-1 accesses.
    vocab_b = lax.broadcasted_iota(jnp.int32, (B, V), 1)
    onehot_u = (vocab_b == pos_u_ref[...]).astype(jnp.float32)      # (B, V)
    onehot_v = (vocab_b == pos_v_ref[...]).astype(jnp.float32)      # (B, V)
    vocab_bk = lax.broadcasted_iota(jnp.int32, (BK, V), 1)
    onehot_neg = (vocab_bk == neg_v_ref[...]).astype(jnp.float32)   # (B*K, V)

    emb_u = jnp.dot(onehot_u, u_w, preferred_element_type=jnp.float32)      # (B, D)
    emb_v = jnp.dot(onehot_v, v_w, preferred_element_type=jnp.float32)      # (B, D)
    neg_emb = jnp.dot(onehot_neg, v_w, preferred_element_type=jnp.float32)  # (B*K, D)

    # --- Positive scores, vectorized over the whole batch.
    score = jnp.sum(emb_u * emb_v, axis=1, keepdims=True)   # (B, 1)
    pos_ls = _log_sigmoid(score)                             # (B, 1)

    # --- Replicate each emb_u row K times with a tiny selection matmul
    #     (row r of `rep` selects batch i = r // K; built with compares only).
    r_iota = lax.broadcasted_iota(jnp.int32, (BK, B), 0)
    c_iota = lax.broadcasted_iota(jnp.int32, (BK, B), 1)
    rep = ((r_iota >= c_iota * K) & (r_iota < (c_iota + 1) * K)).astype(jnp.float32)
    emb_u_rep = jnp.dot(rep, emb_u, preferred_element_type=jnp.float32)      # (B*K, D)

    # --- Negative scores, vectorized over all (i, k) pairs at once.
    neg_score = jnp.sum(neg_emb * emb_u_rep, axis=1, keepdims=True)  # (B*K, 1)
    neg_ls = _log_sigmoid(-neg_score)                                 # (B*K, 1)

    total = jnp.sum(pos_ls) + jnp.sum(neg_ls)
    # Single dense (unmasked) store of a full (8, 128) tile; wrapper reads [0, 0].
    out_ref[...] = jnp.broadcast_to(total, out_ref.shape)


@jax.jit
def skipgram_forward(u_weight, v_weight, pos_u, pos_v, neg_v):
    B = pos_u.shape[0]
    K = neg_v.shape[1]

    pos_u2 = pos_u.reshape(B, 1).astype(jnp.int32)
    pos_v2 = pos_v.reshape(B, 1).astype(jnp.int32)
    neg_v2 = neg_v.reshape(B * K, 1).astype(jnp.int32)

    vmem = pl.BlockSpec(memory_space=pltpu.MemorySpace.VMEM)
    out = pl.pallas_call(
        skipgram_kernel,
        out_shape=jax.ShapeDtypeStruct((8, 128), jnp.float32),
        in_specs=[vmem, vmem, vmem, vmem, vmem],
        out_specs=vmem,
        compiler_params=pltpu.CompilerParams(
            vmem_limit_bytes=16 * 1024 * 1024),
    )(pos_u2, pos_v2, neg_v2,
      u_weight.astype(jnp.float32), v_weight.astype(jnp.float32))

    # forward returns -1 * (sum(score) + sum(neg_score))
    return -out[0, 0]


def skipgram_reference(u_weight, v_weight, pos_u, pos_v, neg_v):
    emb_u = u_weight[pos_u]                   # (B, D)
    emb_v = v_weight[pos_v]                   # (B, D)
    score = jnp.sum(emb_u * emb_v, axis=1)    # (B,)
    score = jax.nn.log_sigmoid(score)
    neg_emb_v = v_weight[neg_v]               # (B, K, D)
    neg_score = jnp.einsum("bkd,bd->bk", neg_emb_v, emb_u)  # (B, K)
    neg_score = jax.nn.log_sigmoid(-neg_score)
    return -(jnp.sum(score) + jnp.sum(neg_score))


if __name__ == "__main__":
    emb_size = 64        # vocabulary size V
    emb_dimension = 32   # embedding dim D
    B = 8                # batch of (center, context) pairs
    K = 5                # negative samples per pair

    key = jax.random.PRNGKey(0)
    k_u, k_v, k_pu, k_pv, k_nv = jax.random.split(key, 5)

    initrange = 0.5 / emb_dimension
    # u_embeddings: uniform(-initrange, initrange) as in init_emb().
    u_weight = jax.random.uniform(
        k_u, (emb_size, emb_dimension), jnp.float32,
        minval=-initrange, maxval=initrange)
    # init_emb() zeros v_embeddings; use small random values instead so the
    # kernel computes something non-trivial (forward semantics unchanged).
    v_weight = jax.random.uniform(
        k_v, (emb_size, emb_dimension), jnp.float32,
        minval=-initrange, maxval=initrange)

    pos_u = jax.random.randint(k_pu, (B,), 0, emb_size, dtype=jnp.int32)
    pos_v = jax.random.randint(k_pv, (B,), 0, emb_size, dtype=jnp.int32)
    neg_v = jax.random.randint(k_nv, (B, K), 0, emb_size, dtype=jnp.int32)

    out = jax.block_until_ready(
        skipgram_forward(u_weight, v_weight, pos_u, pos_v, neg_v))
    ref = skipgram_reference(u_weight, v_weight, pos_u, pos_v, neg_v)
    assert jnp.allclose(out, ref, rtol=1e-5, atol=1e-5), (out, ref)

    print("KERNEL_OK")
</pallas_src>

<mosaic_0001>
module attributes {stable_mosaic.version = 11 : i64} {
  func.func @skipgram_kernel(%arg0: memref<8x1xi32, #tpu.memory_space<vmem>>, %arg1: memref<8x1xi32, #tpu.memory_space<vmem>>, %arg2: memref<40x1xi32, #tpu.memory_space<vmem>>, %arg3: memref<64x32xf32, #tpu.memory_space<vmem>>, %arg4: memref<64x32xf32, #tpu.memory_space<vmem>>, %arg5: memref<8x128xf32, #tpu.memory_space<vmem>>) attributes {dimension_semantics = [], scalar_prefetch = 0 : i64, scratch_operands = 0 : i64, tpu.core_type = #tpu.core_type<tc>} {
    %c0 = arith.constant 0 : index
    %c0_0 = arith.constant 0 : index
    %0 = vector.load %arg3[%c0, %c0_0] : memref<64x32xf32, #tpu.memory_space<vmem>>, vector<64x32xf32>
    %c0_1 = arith.constant 0 : index
    %c0_2 = arith.constant 0 : index
    %1 = vector.load %arg4[%c0_1, %c0_2] : memref<64x32xf32, #tpu.memory_space<vmem>>, vector<64x32xf32>
    %2 = tpu.iota {dimensions = array<i32: 1>} : vector<8x64xi32>
    %c0_3 = arith.constant 0 : index
    %c0_4 = arith.constant 0 : index
    %3 = vector.load %arg0[%c0_3, %c0_4] : memref<8x1xi32, #tpu.memory_space<vmem>>, vector<8x1xi32>
    %4 = vector.broadcast %3 : vector<8x1xi32> to vector<8x64xi32>
    %5 = arith.cmpi eq, %2, %4 : vector<8x64xi32>
    %6 = arith.extui %5 : vector<8x64xi1> to vector<8x64xi32>
    %7 = arith.sitofp %6 : vector<8x64xi32> to vector<8x64xf32>
    %c0_5 = arith.constant 0 : index
    %c0_6 = arith.constant 0 : index
    %8 = vector.load %arg1[%c0_5, %c0_6] : memref<8x1xi32, #tpu.memory_space<vmem>>, vector<8x1xi32>
    %9 = vector.broadcast %8 : vector<8x1xi32> to vector<8x64xi32>
    %10 = arith.cmpi eq, %2, %9 : vector<8x64xi32>
    %11 = arith.extui %10 : vector<8x64xi1> to vector<8x64xi32>
    %12 = arith.sitofp %11 : vector<8x64xi32> to vector<8x64xf32>
    %13 = tpu.iota {dimensions = array<i32: 1>} : vector<40x64xi32>
    %c0_7 = arith.constant 0 : index
    %c0_8 = arith.constant 0 : index
    %14 = vector.load %arg2[%c0_7, %c0_8] : memref<40x1xi32, #tpu.memory_space<vmem>>, vector<40x1xi32>
    %15 = vector.broadcast %14 : vector<40x1xi32> to vector<40x64xi32>
    %16 = arith.cmpi eq, %13, %15 : vector<40x64xi32>
    %17 = arith.extui %16 : vector<40x64xi1> to vector<40x64xi32>
    %18 = arith.sitofp %17 : vector<40x64xi32> to vector<40x64xf32>
    %cst = arith.constant dense<0.000000e+00> : vector<8x32xf32>
    %19 = tpu.matmul %7, %0, %cst {dimension_numbers = #tpu.dot_dimension_numbers<[1], [0], [0], [1], [0, 0, 1, 1], [], []>} : vector<8x64xf32>, vector<64x32xf32>, vector<8x32xf32> -> vector<8x32xf32>
    %cst_9 = arith.constant dense<0.000000e+00> : vector<8x32xf32>
    %20 = tpu.matmul %12, %1, %cst_9 {dimension_numbers = #tpu.dot_dimension_numbers<[1], [0], [0], [1], [0, 0, 1, 1], [], []>} : vector<8x64xf32>, vector<64x32xf32>, vector<8x32xf32> -> vector<8x32xf32>
    %cst_10 = arith.constant dense<0.000000e+00> : vector<40x32xf32>
    %21 = tpu.matmul %18, %1, %cst_10 {dimension_numbers = #tpu.dot_dimension_numbers<[1], [0], [0], [1], [0, 0, 1, 1], [], []>} : vector<40x64xf32>, vector<64x32xf32>, vector<40x32xf32> -> vector<40x32xf32>
    %22 = arith.mulf %19, %20 : vector<8x32xf32>
    %cst_11 = arith.constant dense<0.000000e+00> : vector<8xf32>
    %23 = vector.multi_reduction <add>, %22, %cst_11 [1] : vector<8x32xf32> to vector<8xf32>
    %24 = vector.shape_cast %23 : vector<8xf32> to vector<8x1xf32>
    %cst_12 = arith.constant 0.000000e+00 : f32
    %25 = vector.broadcast %cst_12 : f32 to vector<8x1xf32>
    %26 = arith.minimumf %24, %25 : vector<8x1xf32>
    %27 = math.absf %24 : vector<8x1xf32>
    %cst_13 = arith.constant 0.000000e+00 : f32
    %28 = vector.broadcast %cst_13 : f32 to vector<8x1xf32>
    %29 = arith.subf %28, %27 : vector<8x1xf32>
    %30 = math.exp %29 : vector<8x1xf32>
    %cst_14 = arith.constant 1.000000e+00 : f32
    %31 = vector.broadcast %cst_14 : f32 to vector<8x1xf32>
    %32 = arith.addf %31, %30 : vector<8x1xf32>
    %33 = math.log %32 : vector<8x1xf32>
    %34 = arith.subf %26, %33 : vector<8x1xf32>
    %35 = tpu.iota {dimensions = array<i32: 0>} : vector<40x8xi32>
    %36 = tpu.iota {dimensions = array<i32: 1>} : vector<40x8xi32>
    %c5_i32 = arith.constant 5 : i32
    %37 = vector.broadcast %c5_i32 : i32 to vector<40x8xi32>
    %38 = arith.muli %36, %37 : vector<40x8xi32>
    %39 = arith.cmpi sge, %35, %38 : vector<40x8xi32>
    %c1_i32 = arith.constant 1 : i32
    %40 = vector.broadcast %c1_i32 : i32 to vector<40x8xi32>
    %41 = arith.addi %36, %40 : vector<40x8xi32>
    %c5_i32_15 = arith.constant 5 : i32
    %42 = vector.broadcast %c5_i32_15 : i32 to vector<40x8xi32>
    %43 = arith.muli %41, %42 : vector<40x8xi32>
    %44 = arith.cmpi slt, %35, %43 : vector<40x8xi32>
    %45 = arith.andi %39, %44 : vector<40x8xi1>
    %46 = arith.extui %45 : vector<40x8xi1> to vector<40x8xi32>
    %47 = arith.sitofp %46 : vector<40x8xi32> to vector<40x8xf32>
    %cst_16 = arith.constant dense<0.000000e+00> : vector<40x32xf32>
    %48 = tpu.matmul %47, %19, %cst_16 {dimension_numbers = #tpu.dot_dimension_numbers<[1], [0], [0], [1], [0, 0, 1, 1], [], []>} : vector<40x8xf32>, vector<8x32xf32>, vector<40x32xf32> -> vector<40x32xf32>
    %49 = arith.mulf %21, %48 : vector<40x32xf32>
    %cst_17 = arith.constant dense<0.000000e+00> : vector<40xf32>
    %50 = vector.multi_reduction <add>, %49, %cst_17 [1] : vector<40x32xf32> to vector<40xf32>
    %51 = vector.shape_cast %50 : vector<40xf32> to vector<40x1xf32>
    %cst_18 = arith.constant 0.000000e+00 : f32
    %52 = vector.broadcast %cst_18 : f32 to vector<40x1xf32>
    %53 = arith.subf %52, %51 : vector<40x1xf32>
    %cst_19 = arith.constant 0.000000e+00 : f32
    %54 = vector.broadcast %cst_19 : f32 to vector<40x1xf32>
    %55 = arith.minimumf %53, %54 : vector<40x1xf32>
    %56 = math.absf %53 : vector<40x1xf32>
    %cst_20 = arith.constant 0.000000e+00 : f32
    %57 = vector.broadcast %cst_20 : f32 to vector<40x1xf32>
    %58 = arith.subf %57, %56 : vector<40x1xf32>
    %59 = math.exp %58 : vector<40x1xf32>
    %cst_21 = arith.constant 1.000000e+00 : f32
    %60 = vector.broadcast %cst_21 : f32 to vector<40x1xf32>
    %61 = arith.addf %60, %59 : vector<40x1xf32>
    %62 = math.log %61 : vector<40x1xf32>
    %63 = arith.subf %55, %62 : vector<40x1xf32>
    %64 = vector.shape_cast %34 : vector<8x1xf32> to vector<1x8x1xf32>
    %cst_22 = arith.constant dense<0.000000e+00> : vector<1xf32>
    %65 = vector.multi_reduction <add>, %64, %cst_22 [1, 2] : vector<1x8x1xf32> to vector<1xf32>
    %66 = vector.shape_cast %65 : vector<1xf32> to vector<1x1x1xf32>
    %67 = vector.extract %66[0, 0, 0] : f32 from vector<1x1x1xf32>
    %68 = vector.shape_cast %63 : vector<40x1xf32> to vector<1x40x1xf32>
    %cst_23 = arith.constant dense<0.000000e+00> : vector<1xf32>
    %69 = vector.multi_reduction <add>, %68, %cst_23 [1, 2] : vector<1x40x1xf32> to vector<1xf32>
    %70 = vector.shape_cast %69 : vector<1xf32> to vector<1x1x1xf32>
    %71 = vector.extract %70[0, 0, 0] : f32 from vector<1x1x1xf32>
    %72 = arith.addf %67, %71 : f32
    %73 = vector.broadcast %72 : f32 to vector<8x128xf32>
    %c0_24 = arith.constant 0 : index
    %c0_25 = arith.constant 0 : index
    %74 = vector.load %arg5[%c0_24, %c0_25] : memref<8x128xf32, #tpu.memory_space<vmem>>, vector<8x128xf32>
    tpu.vector_store %arg5[%c0_24, %c0_25], %73 {strides = array<i32>} : memref<8x128xf32, #tpu.memory_space<vmem>>, vector<8x128xf32>,
    return
  }
}

</mosaic_0001>

<bundles_post_ra>
// kernel: skipgram_forward.1
= control target key start
LH: loop header
LB: loop body
LE: loop exit
PB: predicated region body
PF: predicated region fallthrough
CT: control target
= control target key end

     0   :  { %v816_v0 = vmov 0   ;;  %v817_v4 = vmov 0.0|0.0   ;;  %vm818_vm0 = vmmov 0   ;;  %v819_v12 = vmov 0.0   ;;  %s995_s0 = inlined_call_operand.vmem [shape: s32[8,1], index: 0, kind: input, shape index: {}]   ;;  %s996_s1 = inlined_call_operand.vmem [shape: s32[8,1], index: 1, kind: input, shape index: {}]   ;;  %s997_s3 = inlined_call_operand.vmem [shape: f32[64,32], index: 3, kind: input, shape index: {}]   ;;  %s998_s2 = inlined_call_operand.vmem [shape: s32[40,1], index: 2, kind: input, shape index: {}]   ;;  %s999_s4 = inlined_call_operand.vmem [shape: f32[64,32], index: 4, kind: input, shape index: {}]   ;;  %s1000_s5 = inlined_call_operand.vmem [shape: f32[8,128], index: 5, kind: output, shape index: {}]  }
   0x1   :  { %790 = vset.pattern.permute.xlu0 %v816_v0  ;;  %v38_v1 = vld [vmem:[%s995_s0] sm:$0xff]  ;;  %791 = vset.pattern.permute.xlu1 %v816_v0  ;;  %v53_v5 = vld [vmem:[%s998_s2 + $0x8] sm:$0xff]  ;;  %v22_v9 = vld [vmem:[%s997_s3 + $0x10] sm:$0xff]  ;;  %v36_v34 = vlaneseq  ;;  %vm87_vm1 = vcmask 523264   ;;  %vm387_vm14 = vcmask 64512  }
   0x2   :  { %40 = vperm.xlu0 %790, %v38_v1   ;;  %v45_v2 = vld [vmem:[%s996_s1] sm:$0xff]  ;;  %746 = vmatprep.subr.bf16.mxu0 %v817_v4  ;;  %v21_v7 = vld [vmem:[%s997_s3 + $0x8] sm:$0xff]  ;;  %v23_v10 = vld [vmem:[%s997_s3 + $0x18] sm:$0xff] }
   0x3   :  { %v52_v3 = vld [vmem:[%s998_s2] sm:$0xff]  ;;  %758 = vmatprep.subr.bf16.mxu1 %v817_v4  ;;  %676 = vmatprep.mubr.msk.f32.mxu0 %vm818_vm0, %v819_v12  ;;  %v29_v13 = vld [vmem:[%s999_s4 + $0x8] sm:$0xff]  ;;  %v750_v14 = vpack.c.bf16 %v23_v10, %v22_v9  ;;  %v30_v16 = vld [vmem:[%s999_s4 + $0x10] sm:$0xff]  ;;  %v37_v35 = vand.u32 127, %v36_v34  ;;  %v354_v51 = vshrl.u32 %v36_v34, 7 }
   0x4   :  { %58 = vperm.xlu1 %791, %v52_v3   ;;  %v20_v6 = vld [vmem:[%s997_s3] sm:$0xff]  ;;  %695 = vmatprep.mubr.msk.f32.mxu1 %vm818_vm0, %v819_v12  ;;  %v31_v17 = vld [vmem:[%s999_s4 + $0x18] sm:$0xff]  ;;  %v54_v18 = vld [vmem:[%s998_s2 + $0x10] sm:$0xff] }
   0x5   :  { %v747_v8 = vpack.c.bf16 %v21_v7, %v20_v6  ;;  %v28_v11 = vld [vmem:[%s999_s4] sm:$0xff]  ;;  %v25_v20 = vld [vmem:[%s997_s3 + $0x28] sm:$0xff]  ;;  %v55_v21 = vld [vmem:[%s998_s2 + $0x18] sm:$0xff]  ;;  %v762_v22 = vpack.c.bf16 %v31_v17, %v30_v16  ;;  %v365_v50 = vadd.s32 1, %v37_v35  ;;  %v359_v52 = vmul.u32 5, %v37_v35 }
   0x6   :  { %47 = vperm.xlu0 %790, %v45_v2   ;;  %v759_v15 = vpack.c.bf16 %v29_v13, %v28_v11  ;;  %v24_v19 = vld [vmem:[%s997_s3 + $0x20] sm:$0xff]  ;;  %v33_v24 = vld [vmem:[%s999_s4 + $0x28] sm:$0xff]  ;;  %v26_v27 = vld [vmem:[%s997_s3 + $0x30] sm:$0xff]  ;;  %v355_v54 = vadd.s32 8, %v354_v51  ;;  %v356_v55 = vadd.s32 16, %v354_v51  ;;  %v357_v59 = vadd.s32 24, %v354_v51 }
   0x7   :  { %748 = vmatpush3.bf16.msra.mxu0 %v747_v8  ;;  %v32_v23 = vld [vmem:[%s999_s4 + $0x20] sm:$0xff]  ;;  %v753_v25 = vpack.c.bf16 %v25_v20, %v24_v19  ;;  %v27_v28 = vld [vmem:[%s997_s3 + $0x38] sm:$0xff]  ;;  %v34_v30 = vld [vmem:[%s999_s4 + $0x30] sm:$0xff]  ;;  %v366_v53 = vmul.u32 5, %v365_v50  ;;  %vm360_vm9 = vcmp.ge.s32.totalorder %v354_v51, %v359_v52  ;;  %v358_v0 = vadd.s32 32, %v354_v51 }
   0x8   :  { %61 = vperm.xlu1 %791, %v53_v5   ;;  %749 = vmatprep.subr.bf16.mxu0 %v817_v4  ;;  %v56_v26 = vld [vmem:[%s998_s2 + $0x20] sm:$0xff]  ;;  %v765_v29 = vpack.c.bf16 %v33_v24, %v32_v23  ;;  %v35_v31 = vld [vmem:[%s999_s4 + $0x38] sm:$0xff]  ;;  %v756_v32 = vpack.c.bf16 %v27_v28, %v26_v27  ;;  %vm361_vm12 = vcmp.ge.s32.totalorder %v355_v54, %v359_v52 }
   0x9   :  { %760 = vmatpush3.bf16.msra.mxu1 %v759_v15  ;;  %v768_v33 = vpack.c.bf16 %v35_v31, %v34_v30  ;;  %vm367_vm10 = vcmp.lt.s32.totalorder %v354_v51, %v366_v53  ;;  %vm368_vm13 = vcmp.lt.s32.totalorder %v355_v54, %v366_v53 }
   0xa   :  { %761 = vmatprep.subr.bf16.mxu1 %v817_v4  ;;  %64 = vperm.xlu0 %790, %v54_v18   ;;  %vm372_vm11 = vmand %vm360_vm9, %vm367_vm10  ;;  %vm340_vm10 = vcmask 261120  }
   0xb   :  { %751 = vmatpush3.bf16.msra.mxu0 %v750_v14  ;;  %v613_v56 = vsel %vm372_vm11, 1.0, %v819_v12  ;;  %vm373_vm15 = vmand %vm361_vm12, %vm368_vm13 }
   0xc   :  { %67 = vperm.xlu1 %791, %v55_v21   ;;  %752 = vmatprep.subr.bf16.mxu0 %v817_v4  ;;  %v614_v60 = vsel %vm373_vm15, 1.0, %v819_v12 }
   0xd   :  { %763 = vmatpush3.bf16.msra.mxu1 %v762_v22 }
   0xe   :  { %764 = vmatprep.subr.bf16.mxu1 %v817_v4  ;;  %70 = vperm.xlu0 %790, %v56_v26  }
   0xf   :  { %754 = vmatpush3.bf16.msra.mxu0 %v753_v25 }
  0x10   :  { %755 = vmatprep.subr.bf16.mxu0 %v817_v4 }
  0x11   :  { %766 = vmatpush3.bf16.msra.mxu1 %v765_v29 }
  0x12   :  { %767 = vmatprep.subr.bf16.mxu1 %v817_v4 }
  0x13   :  { %757 = vmatpush3.bf16.msra.mxu0 %v756_v32 }
  0x14   :  { %770 = vmatprep.subr.bf16.mxu0 %v817_v4 }
  0x15   :  { %769 = vmatpush3.bf16.msra.mxu1 %v768_v33 }
  0x16   :  { %729 = vmatprep.subr.mxu1 %v819_v12 }
  0x81   :  { %v41_v36 = vpop.permute.xlu0 %40 }
  0x82   :  { %vm42_vm2 = vcmp.eq.s32.totalorder %v37_v35, %v41_v36 }
  0x83   :  { %v599_v37 = vsel %vm42_vm2, 1.0, %v819_v12  ;;  %v59_v40 = vpop.permute.xlu1 %58  ;;  %vm362_vm2 = vcmp.ge.s32.totalorder %v356_v55, %v359_v52 }
  0x84   :  { %677 = vmatmul.mubr.msk.f32.vlgmr.msra.gmra.mrb[0].mxu0 %vm87_vm1, %v599_v37  ;;  %vm72_vm4 = vcmp.eq.s32.totalorder %v37_v35, %v59_v40 }
  0x85   :  { %772 = vmatpush3.bf16.msra.mxu0 %v759_v15  ;;  %v48_v38 = vpop.permute.xlu0 %47  ;;  %714 = vmatprep.mubr.msk.f32.mxu0 %vm818_vm0, %v819_v12  ;;  %v601_v42 = vsel %vm72_vm4, 1.0, %v819_v12  ;;  %vm363_vm4 = vcmp.ge.s32.totalorder %v357_v59, %v359_v52 }
  0x86   :  { %vm49_vm3 = vcmp.eq.s32.totalorder %v37_v35, %v48_v38  ;;  %773 = vmatprep.subr.bf16.mxu0 %v817_v4 }
  0x87   :  { %v600_v39 = vsel %vm49_vm3, 1.0, %v819_v12  ;;  %v62_v41 = vpop.permute.xlu1 %61 }
  0x88   :  { %696 = vmatmul.mubr.msk.f32.vlgmr.msra.gmra.mrb[0].mxu1 %vm87_vm1, %v600_v39  ;;  %vm73_vm5 = vcmp.eq.s32.totalorder %v37_v35, %v62_v41 }
  0x89   :  { %775 = vmatpush3.bf16.msra.mxu0 %v762_v22  ;;  %731 = vmatprep.mubr.msk.f32.mxu1 %vm818_vm0, %v819_v12  ;;  %v65_v43 = vpop.permute.xlu0 %64  ;;  %v602_v44 = vsel %vm73_vm5, 1.0, %v819_v12  ;;  %vm370_vm5 = vcmp.lt.s32.totalorder %v357_v59, %v366_v53 }
  0x8a   :  { %776 = vmatprep.subr.bf16.mxu0 %v817_v4  ;;  %vm74_vm6 = vcmp.eq.s32.totalorder %v37_v35, %v65_v43 }
  0x8b   :  { %v68_v45 = vpop.permute.xlu1 %67  ;;  %v603_v46 = vsel %vm74_vm6, 1.0, %v819_v12  ;;  %vm375_vm6 = vmand %vm363_vm4, %vm370_vm5 }
  0x8c   :  { %vm75_vm7 = vcmp.eq.s32.totalorder %v37_v35, %v68_v45  ;;  %v616_v2 = vsel %vm375_vm6, 1.0, %v819_v12 }
  0x8d   :  { %778 = vmatpush3.bf16.msra.mxu0 %v765_v29  ;;  %v71_v47 = vpop.permute.xlu0 %70  ;;  %v604_v48 = vsel %vm75_vm7, 1.0, %v819_v12  ;;  %vm364_vm7 = vcmp.ge.s32.totalorder %v358_v0, %v359_v52 }
  0x8e   :  { %779 = vmatprep.subr.bf16.mxu0 %v817_v4  ;;  %vm76_vm8 = vcmp.eq.s32.totalorder %v37_v35, %v71_v47 }
  0x8f   :  { %v605_v49 = vsel %vm76_vm8, 1.0, %v819_v12  ;;  %vm371_vm8 = vcmp.lt.s32.totalorder %v358_v0, %v366_v53 }
  0x90   :  { %vm376_vm9 = vmand %vm364_vm7, %vm371_vm8 }
  0x91   :  { %781 = vmatpush3.bf16.msra.mxu0 %v768_v33  ;;  %v617_v3 = vsel %vm376_vm9, 1.0, %v819_v12 }
  0x94   :  { %715 = vmatmul.mubr.msk.f32.vlgmr.msra.gmra.mrb[2].mxu0 %vm87_vm1, %v601_v42 }
  0x95   :  { %717 = vmatprep.mubr.msk.f32.mxu0 %vm818_vm0, %v819_v12 }
  0x98   :  { %718 = vmatmul.mubr.msk.f32.gmra.mrb[4].mxu0 %vm87_vm1, %v602_v44 }
  0x99   :  { %720 = vmatprep.mubr.msk.f32.mxu0 %vm818_vm0, %v819_v12 }
  0x9c   :  { %721 = vmatmul.mubr.msk.f32.gmra.mrb[6].mxu0 %vm87_vm1, %v603_v46 }
  0x9d   :  { %723 = vmatprep.mubr.msk.f32.mxu0 %vm818_vm0, %v819_v12 }
  0xa0   :  { %724 = vmatmul.mubr.msk.f32.gmra.mrb[8].mxu0 %vm87_vm1, %v604_v48 }
  0xa1   :  { %726 = vmatprep.mubr.msk.f32.mxu0 %vm818_vm0, %v819_v12 }
  0xa4   :  { %727 = vmatmul.mubr.msk.f32.gmra.mrb[10].mxu0 %vm87_vm1, %v605_v49  ;;  %vm369_vm1 = vcmp.lt.s32.totalorder %v356_v55, %v366_v53 }
  0xa5   :  { %vm374_vm3 = vmand %vm362_vm2, %vm369_vm1 }
  0xa6   :  { %v615_v1 = vsel %vm374_vm3, 1.0, %v819_v12 }
 0x157   :  { %v157_v57 = vpop.f32.mrb[0].mxu0 }
 0x158   :  { %v678_v58 = vpop.f32.mrb[1].mxu0  ;;  %730 = vmatpush3.msra.mxu1 %v157_v57 }
 0x159   :  { %732 = vmatmul.mubr.msk.f32.vlgmr.msra.gmra.mrb[2].mxu1 %vm387_vm14, %v613_v56 }
 0x15a   :  { %734 = vmatprep.mubr.msk.f32.mxu1 %vm818_vm0, %v819_v12 }
 0x15b   :  { %v230_v61 = vpop.f32.mrb[0].mxu1 }
 0x15c   :  { %v339_v62 = vmul.f32 %v230_v61, %v157_v57  ;;  %v697_v63 = vpop.f32.mrb[1].mxu1 }
 0x15d   :  { %735 = vmatmul.mubr.msk.f32.gmra.mrb[4].mxu1 %vm387_vm14, %v614_v60 }
 0x15e   :  { %737 = vmatprep.mubr.msk.f32.mxu1 %vm818_vm0, %v819_v12  ;;  %v341_v33 = vsel %vm340_vm10, %v339_v62, 0.0 }
 0x161   :  { %738 = vmatmul.mubr.msk.f32.gmra.mrb[6].mxu1 %vm387_vm14, %v615_v1 }
 0x162   :  { %740 = vmatprep.mubr.msk.f32.mxu1 %vm818_vm0, %v819_v12 }
 0x165   :  { %741 = vmatmul.mubr.msk.f32.gmra.mrb[8].mxu1 %vm387_vm14, %v616_v2 }
 0x166   :  { %743 = vmatprep.mubr.msk.f32.mxu1 %vm818_vm0, %v819_v12  ;;  %vm563_vm0 = vcmask 7168  }
 0x167   :  { %v315_v4 = vpop.f32.mrb[2].mxu0 }
 0x168   :  { %v716_v5 = vpop.f32.mrb[3].mxu0 }
 0x169   :  { %744 = vmatmul.mubr.msk.f32.gmra.mrb[10].mxu1 %vm387_vm14, %v617_v3 }
 0x16b   :  { %v320_v6 = vpop.f32.mrb[4].mxu0 }
 0x16c   :  { %v719_v7 = vpop.f32.mrb[5].mxu0 }
 0x16f   :  { %v325_v8 = vpop.f32.mrb[6].mxu0 }
 0x170   :  { %v722_v9 = vpop.f32.mrb[7].mxu0 }
 0x173   :  { %v330_v10 = vpop.f32.mrb[8].mxu0 }
 0x174   :  { %v725_v11 = vpop.f32.mrb[9].mxu0 }
 0x177   :  { %v335_v13 = vpop.f32.mrb[10].mxu0 }
 0x178   :  { %v728_v14 = vpop.f32.mrb[11].mxu0 }
 0x22c   :  { %v469_v15 = vpop.f32.mrb[2].mxu1 }
 0x22d   :  { %v493_v16 = vmul.f32 %v469_v15, %v315_v4  ;;  %v733_v17 = vpop.f32.mrb[3].mxu1 }
 0x22f   :  { %v498_v18 = vsel %vm340_vm10, %v493_v16, 0.0 }
 0x230   :  { %499 = vadd.xlane.f32.xlu1 %v498_v18  ;;  %v474_v12 = vpop.f32.mrb[4].mxu1 }
 0x231   :  { %v494_v19 = vmul.f32 %v474_v12, %v320_v6  ;;  %v736_v20 = vpop.f32.mrb[5].mxu1 }
 0x233   :  { %v501_v21 = vsel %vm340_vm10, %v494_v19, 0.0 }
 0x234   :  { %502 = vadd.xlane.f32.xlu0 %v501_v21  ;;  %v479_v22 = vpop.f32.mrb[6].mxu1 }
 0x235   :  { %v495_v23 = vmul.f32 %v479_v22, %v325_v8  ;;  %v739_v24 = vpop.f32.mrb[7].mxu1 }
 0x237   :  { %v504_v25 = vsel %vm340_vm10, %v495_v23, 0.0 }
 0x238   :  { %v484_v26 = vpop.f32.mrb[8].mxu1  ;;  %505 = vadd.xlane.f32.xlu0 %v504_v25 }
 0x239   :  { %v496_v27 = vmul.f32 %v484_v26, %v330_v10  ;;  %v742_v28 = vpop.f32.mrb[9].mxu1 }
 0x23b   :  { %v507_v29 = vsel %vm340_vm10, %v496_v27, 0.0 }
 0x23c   :  { %v489_v30 = vpop.f32.mrb[10].mxu1  ;;  %508 = vadd.xlane.f32.xlu1 %v507_v29 }
 0x23d   :  { %v497_v31 = vmul.f32 %v489_v30, %v335_v13  ;;  %v745_v32 = vpop.f32.mrb[11].mxu1 }
 0x23f   :  { %v510_v34 = vsel %vm340_vm10, %v497_v31, 0.0 }
 0x240   :  { %342 = vadd.xlane.f32.xlu1 %v341_v33  ;;  %511 = vadd.xlane.f32.xlu0 %v510_v34 }
 0x2bd   :  { %v500_v35 = vpop.xlane.xlu1 %499 }
 0x2be   :  { %v513_v36 = vsub.f32 0.0, %v500_v35 }
 0x2c0   :  { %v523_v37 = vand.u32 2147483647, %v513_v36  ;;  %v518_v19 = vmin.f32 %v513_v36, 0.0 }
 0x2c1   :  { %v503_v38 = vpop.xlane.xlu0 %502 }
 0x2c2   :  { %v528_v39 = vsub.f32 0.0, %v523_v37  ;;  %v514_v40 = vsub.f32 0.0, %v503_v38 }
 0x2c4   :  { %v533_v41 = vmul.f32 1.442695, %v528_v39  ;;  %v524_v42 = vand.u32 2147483647, %v514_v40  ;;  %v519_v18 = vmin.f32 %v514_v40, 0.0 }
 0x2c5   :  { %v506_v43 = vpop.xlane.xlu0 %505 }
 0x2c6   :  { %v529_v44 = vsub.f32 0.0, %v524_v42  ;;  %v515_v45 = vsub.f32 0.0, %v506_v43  ;;  %792 = vpow2.f32 %v533_v41 }
 0x2c8   :  { %v535_v46 = vmul.f32 1.442695, %v529_v44  ;;  %v525_v47 = vand.u32 2147483647, %v515_v45  ;;  %v520_v21 = vmin.f32 %v515_v45, 0.0 }
 0x2c9   :  { %v509_v48 = vpop.xlane.xlu1 %508 }
 0x2ca   :  { %794 = vpow2.f32 %v535_v46  ;;  %v530_v49 = vsub.f32 0.0, %v525_v47  ;;  %v516_v50 = vsub.f32 0.0, %v509_v48 }
 0x2cc   :  { %v537_v51 = vmul.f32 1.442695, %v530_v49  ;;  %v526_v52 = vand.u32 2147483647, %v516_v50  ;;  %v521_v25 = vmin.f32 %v516_v50, 0.0 }
 0x2cd   :  { %v343_v53 = vpop.xlane.xlu1 %342  ;;  %v512_v54 = vpop.xlane.xlu0 %511 }
 0x2ce   :  { %796 = vpow2.f32 %v537_v51  ;;  %v531_v55 = vsub.f32 0.0, %v526_v52  ;;  %v345_v56 = vand.u32 2147483647, %v343_v53  ;;  %v517_v57 = vsub.f32 0.0, %v512_v54 }
 0x2cf   :  { %v344_v30 = vmin.f32 %v343_v53, 0.0 }
 0x2d0   :  { %v539_v58 = vmul.f32 1.442695, %v531_v55  ;;  %v346_v59 = vsub.f32 0.0, %v345_v56  ;;  %v527_v60 = vand.u32 2147483647, %v517_v57  ;;  %v793_v61 = vpop.eup %792  ;;  %v522_v37 = vmin.f32 %v517_v57, 0.0 }
 0x2d1   :  { %v543_v1 = vadd.f32 1.0, %v793_v61 }
 0x2d2   :  { %798 = vpow2.f32 %v539_v58  ;;  %v347_v62 = vmul.f32 1.442695, %v346_v59  ;;  %v532_v63 = vsub.f32 0.0, %v527_v60 }
 0x2d4   :  { %v795_v0 = vpop.eup %794  ;;  %800 = vpow2.f32 %v347_v62  ;;  %v541_v3 = vmul.f32 1.442695, %v532_v63 }
 0x2d5   :  { %v544_v2 = vadd.f32 1.0, %v795_v0 }
 0x2d7   :  { %802 = vlog2.f32 %v544_v2 }
 0x2d8   :  { %v797_v4 = vpop.eup %796  ;;  %804 = vpow2.f32 %v541_v3 }
 0x2d9   :  { %806 = vlog2.f32 %v543_v1  ;;  %v545_v5 = vadd.f32 1.0, %v797_v4 }
 0x2db   :  { %808 = vlog2.f32 %v545_v5 }
 0x2dc   :  { %v799_v6 = vpop.eup %798 }
 0x2dd   :  { %v546_v7 = vadd.f32 1.0, %v799_v6 }
 0x2de   :  { %v801_v8 = vpop.eup %800 }
 0x2df   :  { %810 = vlog2.f32 %v546_v7  ;;  %v349_v9 = vadd.f32 1.0, %v801_v8 }
 0x2e1   :  { %v803_v10 = vpop.eup %802  ;;  %812 = vlog2.f32 %v349_v9 }
 0x2e2   :  { %v805_v11 = vpop.eup %804  ;;  %v551_v15 = vmul.f32 0.6931472, %v803_v10 }
 0x2e3   :  { %v807_v13 = vpop.eup %806  ;;  %v547_v14 = vadd.f32 1.0, %v805_v11 }
 0x2e4   :  { %v549_v17 = vmul.f32 0.6931472, %v807_v13  ;;  %v559_v20 = vsub.f32 %v519_v18, %v551_v15 }
 0x2e5   :  { %v809_v16 = vpop.eup %808  ;;  %814 = vlog2.f32 %v547_v14 }
 0x2e6   :  { %v553_v12 = vmul.f32 0.6931472, %v809_v16  ;;  %v558_v23 = vsub.f32 %v518_v19, %v549_v17  ;;  %v575_v28 = vsel %vm563_vm0, %v559_v20, 0.0 }
 0x2e8   :  { %v560_v24 = vsub.f32 %v520_v21, %v553_v12  ;;  %v574_v32 = vsel %vm563_vm0, %v558_v23, 0.0 }
 0x2e9   :  { %v811_v22 = vpop.eup %810  ;;  %v576_v36 = vadd.f32 %v575_v28, %v574_v32 }
 0x2ea   :  { %v555_v26 = vmul.f32 0.6931472, %v811_v22  ;;  %v577_v34 = vsel %vm563_vm0, %v560_v24, 0.0 }
 0x2eb   :  { %v813_v27 = vpop.eup %812  ;;  %v578_v41 = vadd.f32 %v577_v34, %v576_v36 }
 0x2ec   :  { %v561_v29 = vsub.f32 %v521_v25, %v555_v26  ;;  %v351_v31 = vmul.f32 0.6931472, %v813_v27 }
 0x2ee   :  { %v352_v33 = vsub.f32 %v344_v30, %v351_v31  ;;  %v579_v40 = vsel %vm563_vm0, %v561_v29, 0.0 }
 0x2ef   :  { %v815_v35 = vpop.eup %814  ;;  %v580_v43 = vadd.f32 %v579_v40, %v578_v41 }
 0x2f0   :  { %v564_v38 = vsel %vm563_vm0, %v352_v33, 0.0  ;;  %v557_v39 = vmul.f32 0.6931472, %v815_v35 }
 0x2f1   :  { %565 = vadd.xlane.f32.xlu0 %v564_v38 }
 0x2f2   :  { %v562_v42 = vsub.f32 %v522_v37, %v557_v39 }
 0x2f4   :  { %v581_v44 = vsel %vm563_vm0, %v562_v42, 0.0 }
 0x2f5   :  { %v582_v45 = vadd.f32 %v581_v44, %v580_v43 }
 0x2f7   :  { %583 = vadd.xlane.f32.xlu1 %v582_v45 }
 0x37e   :  { %v566_v46 = vpop.xlane.xlu0 %565 }
 0x37f   :  { %v567_v47 = vrot.slane %v566_v46, 4 }
 0x381   :  { %v568_v48 = vadd.f32 %v567_v47, %v566_v46 }
 0x383   :  { %v569_v49 = vrot.slane %v568_v48, 2 }
 0x384   :  { %v584_v50 = vpop.xlane.xlu1 %583 }
 0x385   :  { %v585_v51 = vrot.slane %v584_v50, 4  ;;  %v570_v52 = vadd.f32 %v569_v49, %v568_v48 }
 0x387   :  { %v586_v53 = vadd.f32 %v585_v51, %v584_v50  ;;  %v571_v54 = vrot.slane %v570_v52, 1 }
 0x389   :  { %v587_v55 = vrot.slane %v586_v53, 2  ;;  %v572_v56 = vadd.f32 %v571_v54, %v570_v52 }
 0x38b   :  { %v588_v57 = vadd.f32 %v587_v55, %v586_v53  ;;  %782 = vpush %v572_v56 }
 0x38d   :  { %v589_v58 = vrot.slane %v588_v57, 1 }
 0x38f   :  { %v590_v59 = vadd.f32 %v589_v58, %v588_v57 }
 0x391   :  { %784 = vpush %v590_v59 }
 0x3bc   :  { %s783_s3 = spop %782 }
 0x3c2   :  { %s785_s4 = spop %784 }
 0x3c3   :  { %s592_s9 = sadd.f32 %s785_s4, %s783_s3 }
 0x3c5   :  { %v593_v60 = vstv %s592_s9 }
 0x3c6   :  { %594 = vst [vmem:[%s1000_s5] sm:$0xff] %v593_v60 }

</bundles_post_ra>
